<compile_context>
chip_gen: v6e
topology: v6e:2x2x1
jax: 0.10.0
libtpu: 0.0.40
codegen_flags: <defaults>
</compile_context>

<pallas_src>
import math
import functools

import jax
import jax.numpy as jnp
from jax import lax
from jax.experimental import pallas as pl
from jax.experimental.pallas import tpu as pltpu


_NEG_INF = -1e30  # large-negative finite (safe for online softmax bookkeeping)


# ----------------------------- tiling helpers --------------------------------

def _tile_and_pad(n, target, align):
    """(tile, padded_n): tile is the full extent or an `align`-multiple."""
    if n <= target:
        return n, n
    tile = max(align, (target // align) * align)
    return tile, ((n + tile - 1) // tile) * tile


def _pick_q_tiles(s, target=256):
    """Query tile (multiple of 8) and padded sequence length."""
    s8 = ((s + 7) // 8) * 8
    if s8 <= target:
        return s8, s8
    nq = -(-s // target)
    tq = ((-(-s // nq) + 7) // 8) * 8
    return tq, tq * nq


def _pick_kv_block(length, target=512):
    """KV tile: full extent, or the largest multiple of 8 <= target dividing length."""
    if length <= target:
        return length
    t = (target // 8) * 8
    while t >= 8:
        if length % t == 0:
            return t
        t -= 8
    return length


# --------------------------- tiled matmul kernel ------------------------------

def _matmul_kernel(x_ref, w_ref, o_ref, acc_ref):
    @pl.when(pl.program_id(2) == 0)
    def _():
        acc_ref[...] = jnp.zeros_like(acc_ref)

    acc_ref[...] += jnp.dot(
        x_ref[...], w_ref[...], preferred_element_type=jnp.float32
    )

    @pl.when(pl.program_id(2) == pl.num_programs(2) - 1)
    def _():
        o_ref[...] = acc_ref[...].astype(o_ref.dtype)


def linear(x2d, w, *, out_dtype=None, tm=512, tn=512, tk=512):
    """(M, K) @ (K, N) -> (M, N); tiled/pipelined Pallas matmul, f32 accumulation.

    Tiles are either the full extent or aligned multiples (8 sublane / 128 lane);
    inputs are zero-padded (and the output sliced) when the shape is ragged.
    """
    M, K = x2d.shape
    K2, N = w.shape
    assert K == K2
    out_dtype = out_dtype if out_dtype is not None else x2d.dtype

    tm, Mp = _tile_and_pad(M, tm, 8)
    tn, Np = _tile_and_pad(N, tn, 128)
    tk, Kp = _tile_and_pad(K, tk, 128)
    if (Mp, Kp) != (M, K):
        x2d = jnp.pad(x2d, ((0, Mp - M), (0, Kp - K)))
    if (Kp, Np) != (K, N):
        w = jnp.pad(w, ((0, Kp - K), (0, Np - N)))

    out = pl.pallas_call(
        _matmul_kernel,
        out_shape=jax.ShapeDtypeStruct((Mp, Np), out_dtype),
        grid=(Mp // tm, Np // tn, Kp // tk),
        in_specs=[
            pl.BlockSpec((tm, tk), lambda i, j, k: (i, k)),
            pl.BlockSpec((tk, tn), lambda i, j, k: (k, j)),
        ],
        out_specs=pl.BlockSpec((tm, tn), lambda i, j, k: (i, j)),
        scratch_shapes=[pltpu.VMEM((tm, tn), jnp.float32)],
        compiler_params=pltpu.CompilerParams(
            dimension_semantics=("parallel", "parallel", "arbitrary")
        ),
    )(x2d, w)

    if (Mp, Np) != (M, N):
        out = out[:M, :N]
    return out


# --------------------------- flash attention kernel ---------------------------

def _flash_attn_kernel(sp_ref, q_ref, k_ref, v_ref, o_ref,
                       q_sc, m_sc, l_sc, acc_sc, *, scale, tq, tk, n_rep):
    qi = pl.program_id(2)
    kv = pl.program_id(3)
    start_pos = sp_ref[0]
    kv_len = sp_ref[1]
    d = acc_sc.shape[-1]
    rtq = n_rep * tq

    # per-(b, group, q-block) init; 1/sqrt(D) scaling hoisted out of the kv loop
    @pl.when(kv == 0)
    def _():
        q = q_ref[0].astype(jnp.float32).reshape(rtq, d)   # (n_rep*tq, D)
        q_sc[...] = (q * scale).astype(q_sc.dtype)
        m_sc[...] = jnp.full_like(m_sc, _NEG_INF)
        l_sc[...] = jnp.zeros_like(l_sc)
        acc_sc[...] = jnp.zeros_like(acc_sc)

    block_start = kv * tk
    q_lo = start_pos + qi * tq          # first query position of this q block
    q_hi = q_lo + tq - 1                # last query position of this q block

    # causal / length block skipping (the K/V index_map clamp also prevents the
    # DMA for skipped blocks -- see attention_core)
    should_run = jnp.logical_and(block_start < kv_len, block_start <= q_hi)

    @pl.when(should_run)
    def _():
        k = k_ref[0, 0]                 # (tk, D)
        v = v_ref[0, 0]                 # (tk, D)
        # scores = q @ k^T without materializing a transpose
        s = lax.dot_general(
            q_sc[...], k, (((1,), (1,)), ((), ())),
            preferred_element_type=jnp.float32,
        )                               # (n_rep*tq, tk) f32

        def update(mask):
            m_prev = m_sc[...]
            s_max = s if mask is None else jnp.where(mask, s, _NEG_INF)
            m_new = jnp.maximum(m_prev, jnp.max(s_max, axis=-1, keepdims=True))
            alpha = jnp.exp(m_prev - m_new)
            p = jnp.exp(s - m_new)
            if mask is not None:
                p = jnp.where(mask, p, 0.0)   # robust even for fully-masked rows
            l_sc[...] = alpha * l_sc[...] + jnp.sum(p, axis=-1, keepdims=True)
            acc_sc[...] = alpha * acc_sc[...] + jnp.dot(
                p.astype(v.dtype), v, preferred_element_type=jnp.float32
            )
            m_sc[...] = m_new

        # interior blocks (fully visible, fully inside the live cache): skip mask math
        interior = jnp.logical_and(block_start + tk <= q_lo + 1,
                                   block_start + tk <= kv_len)

        @pl.when(interior)
        def _():
            update(None)

        @pl.when(jnp.logical_not(interior))
        def _():
            qpos = lax.broadcasted_iota(jnp.int32, (n_rep, tq, tk), 1)
            qpos = qpos.reshape(rtq, tk) + q_lo
            kpos = lax.broadcasted_iota(jnp.int32, (rtq, tk), 1) + block_start
            update(jnp.logical_and(kpos <= qpos, kpos < kv_len))

    # finalize: normalize and write each head's (tq, D) slab lane-contiguously
    @pl.when(kv == pl.num_programs(3) - 1)
    def _():
        for r in range(n_rep):
            out_r = (acc_sc[r * tq:(r + 1) * tq, :] /
                     l_sc[r * tq:(r + 1) * tq, :]).astype(o_ref.dtype)
            if len(o_ref.shape) == 4:      # (1, 1, tq, n_rep*D) fallback layout
                o_ref[0, 0, :, r * d:(r + 1) * d] = out_r
            else:                          # (1, tq, n_rep*D) direct (B, S, H*D) layout
                o_ref[0, :, r * d:(r + 1) * d] = out_r


def attention_core(q, k, v, *, n_rep, start_pos, kv_len, scale,
                   tq_target=256, kv_block=512):
    """q: (B, H, S, D); k/v: (B, KH, L, D) with KH = H // n_rep.

    Returns (B, S, H*D). start_pos / kv_len are dynamic scalars (SMEM prefetch),
    so decode steps reuse one compiled kernel.
    """
    B, H, S, D = q.shape
    _, KH, L, _ = k.shape
    assert KH * n_rep == H

    tq, s_pad = _pick_q_tiles(S, tq_target)
    if s_pad != S:
        q = jnp.pad(q, ((0, 0), (0, 0), (0, s_pad - S), (0, 0)))
    tk = _pick_kv_block(L, kv_block)
    grid = (B, KH, s_pad // tq, L // tk)

    direct_out = (n_rep * D) % 128 == 0 or KH == 1
    if direct_out:
        out_shape = jax.ShapeDtypeStruct((B, s_pad, H * D), q.dtype)
        out_spec = pl.BlockSpec((1, tq, n_rep * D),
                                lambda b, g, qi, kv, sp: (b, qi, g))
    else:
        out_shape = jax.ShapeDtypeStruct((B, KH, s_pad, n_rep * D), q.dtype)
        out_spec = pl.BlockSpec((1, 1, tq, n_rep * D),
                                lambda b, g, qi, kv, sp: (b, g, qi, 0))

    def kv_index_map(b, g, qi, kv, sp):
        # clamp to the last block that is causally visible for this q block and
        # inside the live cache -> skipped blocks are never DMA'd from HBM.
        last_needed = jnp.minimum(sp[1], sp[0] + (qi + 1) * tq)
        last_block = lax.div(last_needed - 1, jnp.int32(tk))
        return (b, g, jnp.minimum(kv, last_block), 0)

    sp = jnp.stack([jnp.asarray(start_pos, jnp.int32),
                    jnp.asarray(kv_len, jnp.int32)])

    kernel = functools.partial(_flash_attn_kernel,
                               scale=scale, tq=tq, tk=tk, n_rep=n_rep)
    out = pl.pallas_call(
        kernel,
        out_shape=out_shape,
        grid_spec=pltpu.PrefetchScalarGridSpec(
            num_scalar_prefetch=1,
            grid=grid,
            in_specs=[
                # all n_rep query heads of the group ride in one block
                pl.BlockSpec((1, n_rep, tq, D),
                             lambda b, g, qi, kv, sp: (b, g, qi, 0)),
                pl.BlockSpec((1, 1, tk, D), kv_index_map),
                pl.BlockSpec((1, 1, tk, D), kv_index_map),
            ],
            out_specs=out_spec,
            scratch_shapes=[
                pltpu.VMEM((n_rep * tq, D), q.dtype),      # scaled q (per q block)
                pltpu.VMEM((n_rep * tq, 1), jnp.float32),  # running max m
                pltpu.VMEM((n_rep * tq, 1), jnp.float32),  # running sum l
                pltpu.VMEM((n_rep * tq, D), jnp.float32),  # output accumulator
            ],
        ),
        compiler_params=pltpu.CompilerParams(
            dimension_semantics=("parallel", "parallel", "parallel", "arbitrary")
        ),
    )(sp, q, k, v)

    if not direct_out:
        out = out.transpose(0, 2, 1, 3).reshape(B, s_pad, H * D)
    if s_pad != S:
        out = out[:, :S]
    return out


# -------------------------------- JAX glue ------------------------------------

def precompute_rotary(head_dim, max_seq_len, theta=10000.0):
    freqs = 1.0 / (theta ** (jnp.arange(0, head_dim, 2, dtype=jnp.float32) / head_dim))
    t = jnp.arange(max_seq_len, dtype=jnp.float32)
    angles = jnp.outer(t, freqs)  # (max_seq_len, head_dim // 2)
    return jnp.cos(angles), jnp.sin(angles)


def apply_rotary_emb(x, cos, sin):
    """x: (b, s, h, d); cos/sin: (s, d//2). Interleaved-pair rotation, equivalent
    to torch.view_as_complex on the trailing (-1, 2) reshape."""
    # TODO(synk): fuse rotary into the QKV-projection kernel epilogue
    # (pltpu.roll-based pair swap) instead of XLA-level pair unpacking.
    xf = x.astype(jnp.float32).reshape(*x.shape[:-1], -1, 2)
    x_even = xf[..., 0]
    x_odd = xf[..., 1]
    c = cos[None, :, None, :]
    s = sin[None, :, None, :]
    out_even = x_even * c - x_odd * s
    out_odd = x_even * s + x_odd * c
    return jnp.stack([out_even, out_odd], axis=-1).reshape(x.shape).astype(x.dtype)


def init_params(key, dim, n_heads, n_kv_heads, dtype=jnp.bfloat16):
    head_dim = dim // n_heads
    k1, k2, k3, k4 = jax.random.split(key, 4)
    scale = 1.0 / math.sqrt(dim)
    # stored (in_features, out_features); q/k/v fused along the output dim
    wq = jax.random.normal(k1, (dim, n_heads * head_dim), jnp.float32) * scale
    wk = jax.random.normal(k2, (dim, n_kv_heads * head_dim), jnp.float32) * scale
    wv = jax.random.normal(k3, (dim, n_kv_heads * head_dim), jnp.float32) * scale
    wo = jax.random.normal(k4, (n_heads * head_dim, dim), jnp.float32) * scale
    return {
        "wqkv": jnp.concatenate([wq, wk, wv], axis=1).astype(dtype),
        "wo": wo.astype(dtype),
    }


def attention_forward(params, cache_k, cache_v, x, cos_full, sin_full, start_pos,
                      *, n_heads, n_kv_heads):
    """KV cache layout: (max_batch, n_kv_heads, max_seq_len, head_dim)."""
    bsz, seqlen, dim = x.shape
    head_dim = dim // n_heads
    n_rep = n_heads // n_kv_heads
    q_out = n_heads * head_dim
    kv_out = n_kv_heads * head_dim
    compute_dtype = params["wqkv"].dtype
    start_pos = jnp.asarray(start_pos, jnp.int32)

    # fused QKV projection: single tiled bf16 matmul, x read from HBM once
    x2d = x.astype(compute_dtype).reshape(bsz * seqlen, dim)
    qkv = linear(x2d, params["wqkv"])                       # (B*S, q_out + 2*kv_out)
    xq = qkv[:, :q_out].reshape(bsz, seqlen, n_heads, head_dim)
    xk = qkv[:, q_out:q_out + kv_out].reshape(bsz, seqlen, n_kv_heads, head_dim)
    xv = qkv[:, q_out + kv_out:].reshape(bsz, seqlen, n_kv_heads, head_dim)

    cos = lax.dynamic_slice_in_dim(cos_full, start_pos, seqlen, axis=0)
    sin = lax.dynamic_slice_in_dim(sin_full, start_pos, seqlen, axis=0)
    xq = apply_rotary_emb(xq, cos, sin)
    xk = apply_rotary_emb(xk, cos, sin)

    # KV-cache write: cache already stored (B, KH, L, D) -> only the fresh
    # tokens are rearranged; no full-cache transpose, in-place via donation.
    xk_t = xk.transpose(0, 2, 1, 3).astype(cache_k.dtype)   # (b, kh, s, d)
    xv_t = xv.transpose(0, 2, 1, 3).astype(cache_v.dtype)
    cache_k = lax.dynamic_update_slice_in_dim(cache_k, xk_t, start_pos, axis=2)
    cache_v = lax.dynamic_update_slice_in_dim(cache_v, xv_t, start_pos, axis=2)

    q_t = xq.transpose(0, 2, 1, 3)                           # (b, h, s, d)
    out = attention_core(
        q_t, cache_k[:bsz], cache_v[:bsz],
        n_rep=n_rep, start_pos=start_pos, kv_len=start_pos + seqlen,
        scale=1.0 / math.sqrt(head_dim),
    )                                                        # (b, s, h*d)

    out2d = out.reshape(bsz * seqlen, q_out)
    y = linear(out2d, params["wo"], out_dtype=x.dtype)
    return y.reshape(bsz, seqlen, dim), cache_k, cache_v


attention_forward_jit = jax.jit(
    attention_forward,
    static_argnames=("n_heads", "n_kv_heads"),
    donate_argnames=("cache_k", "cache_v"),
)


# ------------------------------ pure-JAX reference ----------------------------

def reference_forward(params, cache_k, cache_v, x, cos_full, sin_full, start_pos,
                      n_heads, n_kv_heads):
    """f32 reference mirroring the torch module (cache layout (B, KH, L, D))."""
    bsz, seqlen, dim = x.shape
    head_dim = dim // n_heads
    n_rep = n_heads // n_kv_heads
    q_out = n_heads * head_dim
    kv_out = n_kv_heads * head_dim
    w = params["wqkv"].astype(jnp.float32)
    wo = params["wo"].astype(jnp.float32)

    xf = x.astype(params["wqkv"].dtype).astype(jnp.float32)
    qkv = xf.reshape(bsz * seqlen, dim) @ w
    xq = qkv[:, :q_out].reshape(bsz, seqlen, n_heads, head_dim)
    xk = qkv[:, q_out:q_out + kv_out].reshape(bsz, seqlen, n_kv_heads, head_dim)
    xv = qkv[:, q_out + kv_out:].reshape(bsz, seqlen, n_kv_heads, head_dim)

    cos = cos_full[start_pos:start_pos + seqlen]
    sin = sin_full[start_pos:start_pos + seqlen]
    xq = apply_rotary_emb(xq, cos, sin)
    xk = apply_rotary_emb(xk, cos, sin)

    cache_k = cache_k.at[:bsz, :, start_pos:start_pos + seqlen].set(
        xk.transpose(0, 2, 1, 3))
    cache_v = cache_v.at[:bsz, :, start_pos:start_pos + seqlen].set(
        xv.transpose(0, 2, 1, 3))
    kv_len = start_pos + seqlen
    keys = jnp.repeat(cache_k[:bsz, :, :kv_len], n_rep, axis=1)     # (b, h, L, d)
    vals = jnp.repeat(cache_v[:bsz, :, :kv_len], n_rep, axis=1)

    qh = xq.transpose(0, 2, 1, 3)                                   # (b, h, s, d)
    scores = jnp.einsum('bhsd,bhld->bhsl', qh, keys) / math.sqrt(head_dim)
    qpos = start_pos + jnp.arange(seqlen)[:, None]
    kpos = jnp.arange(kv_len)[None, :]
    scores = jnp.where((kpos <= qpos)[None, None], scores, -jnp.inf)
    probs = jax.nn.softmax(scores, axis=-1)
    out = jnp.einsum('bhsl,bhld->bhsd', probs, vals)
    out = out.transpose(0, 2, 1, 3).reshape(bsz * seqlen, q_out)
    y = out @ wo
    return y.reshape(bsz, seqlen, dim), cache_k, cache_v


# ---------------------------------- main ---------------------------------------

if __name__ == "__main__":
    def _check(name, got, want, atol=5e-2, rtol=5e-2):
        got = got.astype(jnp.float32)
        want = want.astype(jnp.float32)
        err = float(jnp.max(jnp.abs(got - want)))
        assert bool(jnp.allclose(got, want, atol=atol, rtol=rtol)), \
            f"{name}: mismatch, max abs err = {err}"

    def run_case(key, *, dim, n_heads, n_kv_heads, bsz, prefill_len,
                 max_batch, max_seq, n_decode):
        head_dim = dim // n_heads
        kp, kx, kd = jax.random.split(key, 3)
        params = init_params(kp, dim, n_heads, n_kv_heads, dtype=jnp.bfloat16)
        cos_full, sin_full = precompute_rotary(head_dim, max_seq)

        cache_k = jnp.zeros((max_batch, n_kv_heads, max_seq, head_dim), jnp.bfloat16)
        cache_v = jnp.zeros_like(cache_k)
        ref_ck = jnp.zeros((max_batch, n_kv_heads, max_seq, head_dim), jnp.float32)
        ref_cv = jnp.zeros_like(ref_ck)

        # prefill
        x = jax.random.normal(kx, (bsz, prefill_len, dim), jnp.float32)
        out, cache_k, cache_v = attention_forward_jit(
            params, cache_k, cache_v, x, cos_full, sin_full, 0,
            n_heads=n_heads, n_kv_heads=n_kv_heads)
        out = jax.block_until_ready(out)
        ref, ref_ck, ref_cv = reference_forward(
            params, ref_ck, ref_cv, x, cos_full, sin_full, 0, n_heads, n_kv_heads)
        assert out.shape == (bsz, prefill_len, dim)
        assert bool(jnp.all(jnp.isfinite(out)))
        _check("prefill", out, ref)

        # decode (dynamic start_pos -> no recompilation across steps)
        pos = prefill_len
        for step in range(n_decode):
            xd = jax.random.normal(jax.random.fold_in(kd, step), (bsz, 1, dim),
                                   jnp.float32)
            out, cache_k, cache_v = attention_forward_jit(
                params, cache_k, cache_v, xd, cos_full, sin_full, pos,
                n_heads=n_heads, n_kv_heads=n_kv_heads)
            out = jax.block_until_ready(out)
            ref, ref_ck, ref_cv = reference_forward(
                params, ref_ck, ref_cv, xd, cos_full, sin_full, pos,
                n_heads, n_kv_heads)
            assert out.shape == (bsz, 1, dim)
            assert bool(jnp.all(jnp.isfinite(out)))
            _check(f"decode@{pos}", out, ref)
            pos += 1

    key = jax.random.PRNGKey(0)
    k1, k2 = jax.random.split(key)
    # GQA config (grouped K/V reuse, fallback output layout), prefill + 2 decode steps
    run_case(k1, dim=32, n_heads=4, n_kv_heads=2, bsz=2,
             prefill_len=8, max_batch=2, max_seq=16, n_decode=2)
    # MQA config (single KV head -> direct (B, S, H*D) output layout path)
    run_case(k2, dim=32, n_heads=4, n_kv_heads=1, bsz=2,
             prefill_len=8, max_batch=2, max_seq=16, n_decode=0)

    print("KERNEL_OK")
</pallas_src>

<mosaic_0001>
module attributes {stable_mosaic.version = 11 : i64} {
  func.func @_matmul_kernel(%arg0: i32, %arg1: i32, %arg2: i32, %arg3: memref<16x32xbf16, #tpu.memory_space<vmem>>, %arg4: memref<32x64xbf16, #tpu.memory_space<vmem>>, %arg5: memref<16x64xbf16, #tpu.memory_space<vmem>>, %arg6: memref<16x64xf32, #tpu.memory_space<vmem>>) attributes {dimension_semantics = [#tpu.dimension_semantics<parallel>, #tpu.dimension_semantics<parallel>, #tpu.dimension_semantics<arbitrary>], iteration_bounds = array<i64: 1, 1, 1>, scalar_prefetch = 0 : i64, scratch_operands = 1 : i64, tpu.core_type = #tpu.core_type<tc>, window_params = [{transform_indices = @transform_0, window_bounds = array<i64: 16, 32>}, {transform_indices = @transform_1, window_bounds = array<i64: 32, 64>}, {transform_indices = @transform_2, window_bounds = array<i64: 16, 64>}]} {
    %c0_i32 = arith.constant 0 : i32
    %0 = arith.cmpi eq, %arg2, %c0_i32 : i32
    %1 = arith.extui %0 : i1 to i32
    %c0_i32_0 = arith.constant 0 : i32
    %2 = arith.cmpi ne, %1, %c0_i32_0 : i32
    scf.if %2 {
      %cst_10 = arith.constant 0.000000e+00 : f32
      %12 = vector.broadcast %cst_10 : f32 to vector<16x64xf32>
      %c0_11 = arith.constant 0 : index
      %c0_12 = arith.constant 0 : index
      %13 = vector.load %arg6[%c0_11, %c0_12] : memref<16x64xf32, #tpu.memory_space<vmem>>, vector<16x64xf32>
      tpu.vector_store %arg6[%c0_11, %c0_12], %12 {strides = array<i32>} : memref<16x64xf32, #tpu.memory_space<vmem>>, vector<16x64xf32>,
    } else {
    }
    %c0 = arith.constant 0 : index
    %c0_1 = arith.constant 0 : index
    %3 = vector.load %arg6[%c0, %c0_1] : memref<16x64xf32, #tpu.memory_space<vmem>>, vector<16x64xf32>
    %c0_2 = arith.constant 0 : index
    %c0_3 = arith.constant 0 : index
    %4 = vector.load %arg3[%c0_2, %c0_3] : memref<16x32xbf16, #tpu.memory_space<vmem>>, vector<16x32xbf16>
    %c0_4 = arith.constant 0 : index
    %c0_5 = arith.constant 0 : index
    %5 = vector.load %arg4[%c0_4, %c0_5] : memref<32x64xbf16, #tpu.memory_space<vmem>>, vector<32x64xbf16>
    %cst = arith.constant dense<0.000000e+00> : vector<16x64xf32>
    %6 = tpu.matmul %4, %5, %cst {dimension_numbers = #tpu.dot_dimension_numbers<[1], [0], [0], [1], [0, 0, 1, 1], [], []>} : vector<16x32xbf16>, vector<32x64xbf16>, vector<16x64xf32> -> vector<16x64xf32>
    %7 = arith.addf %3, %6 : vector<16x64xf32>
    %c0_6 = arith.constant 0 : index
    %c0_7 = arith.constant 0 : index
    %8 = vector.load %arg6[%c0_6, %c0_7] : memref<16x64xf32, #tpu.memory_space<vmem>>, vector<16x64xf32>
    tpu.vector_store %arg6[%c0_6, %c0_7], %7 {strides = array<i32>} : memref<16x64xf32, #tpu.memory_space<vmem>>, vector<16x64xf32>,
    %c0_i32_8 = arith.constant 0 : i32
    %9 = arith.cmpi eq, %arg2, %c0_i32_8 : i32
    %10 = arith.extui %9 : i1 to i32
    %c0_i32_9 = arith.constant 0 : i32
    %11 = arith.cmpi ne, %10, %c0_i32_9 : i32
    scf.if %11 {
      %c0_10 = arith.constant 0 : index
      %c0_11 = arith.constant 0 : index
      %12 = vector.load %arg6[%c0_10, %c0_11] : memref<16x64xf32, #tpu.memory_space<vmem>>, vector<16x64xf32>
      %13 = arith.truncf %12 : vector<16x64xf32> to vector<16x64xbf16>
      %c0_12 = arith.constant 0 : index
      %c0_13 = arith.constant 0 : index
      %14 = vector.load %arg5[%c0_12, %c0_13] : memref<16x64xbf16, #tpu.memory_space<vmem>>, vector<16x64xbf16>
      tpu.vector_store %arg5[%c0_12, %c0_13], %13 {strides = array<i32>} : memref<16x64xbf16, #tpu.memory_space<vmem>>, vector<16x64xbf16>,
    } else {
    }
    return
  }
  func.func @transform_0(%arg0: i32, %arg1: i32, %arg2: i32) -> (i32, i32) {
    %c0_i32 = arith.constant 0 : i32
    return %arg0, %arg2 : i32, i32
  }
  func.func @transform_1(%arg0: i32, %arg1: i32, %arg2: i32) -> (i32, i32) {
    %c0_i32 = arith.constant 0 : i32
    return %arg2, %arg1 : i32, i32
  }
  func.func @transform_2(%arg0: i32, %arg1: i32, %arg2: i32) -> (i32, i32) {
    %c0_i32 = arith.constant 0 : i32
    return %arg0, %arg1 : i32, i32
  }
}

module attributes {stable_mosaic.version = 11 : i64} {
  func.func @_flash_attn_kernel(%arg0: i32, %arg1: i32, %arg2: i32, %arg3: i32, %arg4: memref<2xi32, #tpu.memory_space<smem>>, %arg5: memref<1x2x8x8xbf16, #tpu.memory_space<vmem>>, %arg6: memref<1x1x16x8xbf16, #tpu.memory_space<vmem>>, %arg7: memref<1x1x16x8xbf16, #tpu.memory_space<vmem>>, %arg8: memref<1x1x8x16xbf16, #tpu.memory_space<vmem>>, %arg9: memref<16x8xbf16, #tpu.memory_space<vmem>>, %arg10: memref<16x1xf32, #tpu.memory_space<vmem>>, %arg11: memref<16x1xf32, #tpu.memory_space<vmem>>, %arg12: memref<16x8xf32, #tpu.memory_space<vmem>>) attributes {dimension_semantics = [#tpu.dimension_semantics<parallel>, #tpu.dimension_semantics<parallel>, #tpu.dimension_semantics<parallel>, #tpu.dimension_semantics<arbitrary>], iteration_bounds = array<i64: 2, 2, 1, 1>, scalar_prefetch = 1 : i64, scratch_operands = 4 : i64, tpu.core_type = #tpu.core_type<tc>, window_params = [{transform_indices = @transform_0, window_bounds = array<i64: 1, 2, 8, 8>}, {transform_indices = @transform_1, window_bounds = array<i64: 1, 1, 16, 8>}, {transform_indices = @transform_2, window_bounds = array<i64: 1, 1, 16, 8>}, {transform_indices = @transform_3, window_bounds = array<i64: 1, 1, 8, 16>}]} {
    %c0 = arith.constant 0 : index
    %0 = memref.load %arg4[%c0] : memref<2xi32, #tpu.memory_space<smem>>
    %c1 = arith.constant 1 : index
    %1 = memref.load %arg4[%c1] : memref<2xi32, #tpu.memory_space<smem>>
    %c0_i32 = arith.constant 0 : i32
    %2 = arith.cmpi eq, %arg3, %c0_i32 : i32
    %3 = arith.extui %2 : i1 to i32
    %c0_i32_0 = arith.constant 0 : i32
    %4 = arith.cmpi ne, %3, %c0_i32_0 : i32
    scf.if %4 {
      %c0_5 = arith.constant 0 : index
      %c0_6 = arith.constant 0 : index
      %c0_7 = arith.constant 0 : index
      %c0_8 = arith.constant 0 : index
      %18 = vector.load %arg5[%c0_5, %c0_6, %c0_7, %c0_8] : memref<1x2x8x8xbf16, #tpu.memory_space<vmem>>, vector<1x2x8x8xbf16>
      %19 = vector.shape_cast %18 : vector<1x2x8x8xbf16> to vector<2x8x8xbf16>
      %20 = arith.extf %19 : vector<2x8x8xbf16> to vector<2x8x8xf32>
      %21 = vector.shape_cast %20 : vector<2x8x8xf32> to vector<16x8xf32>
      %cst = arith.constant 0.353553385 : f32
      %22 = vector.broadcast %cst : f32 to vector<16x8xf32>
      %23 = arith.mulf %21, %22 : vector<16x8xf32>
      %24 = arith.truncf %23 : vector<16x8xf32> to vector<16x8xbf16>
      %c0_9 = arith.constant 0 : index
      %c0_10 = arith.constant 0 : index
      %25 = vector.load %arg9[%c0_9, %c0_10] : memref<16x8xbf16, #tpu.memory_space<vmem>>, vector<16x8xbf16>
      tpu.vector_store %arg9[%c0_9, %c0_10], %24 {strides = array<i32>} : memref<16x8xbf16, #tpu.memory_space<vmem>>, vector<16x8xbf16>,
      %cst_11 = arith.constant -1.000000e+30 : f32
      %26 = vector.broadcast %cst_11 : f32 to vector<16x1xf32>
      %c0_12 = arith.constant 0 : index
      %c0_13 = arith.constant 0 : index
      %27 = vector.load %arg10[%c0_12, %c0_13] : memref<16x1xf32, #tpu.memory_space<vmem>>, vector<16x1xf32>
      tpu.vector_store %arg10[%c0_12, %c0_13], %26 {strides = array<i32>} : memref<16x1xf32, #tpu.memory_space<vmem>>, vector<16x1xf32>,
      %cst_14 = arith.constant 0.000000e+00 : f32
      %28 = vector.broadcast %cst_14 : f32 to vector<16x1xf32>
      %c0_15 = arith.constant 0 : index
      %c0_16 = arith.constant 0 : index
      %29 = vector.load %arg11[%c0_15, %c0_16] : memref<16x1xf32, #tpu.memory_space<vmem>>, vector<16x1xf32>
      tpu.vector_store %arg11[%c0_15, %c0_16], %28 {strides = array<i32>} : memref<16x1xf32, #tpu.memory_space<vmem>>, vector<16x1xf32>,
      %cst_17 = arith.constant 0.000000e+00 : f32
      %30 = vector.broadcast %cst_17 : f32 to vector<16x8xf32>
      %c0_18 = arith.constant 0 : index
      %c0_19 = arith.constant 0 : index
      %31 = vector.load %arg12[%c0_18, %c0_19] : memref<16x8xf32, #tpu.memory_space<vmem>>, vector<16x8xf32>
      tpu.vector_store %arg12[%c0_18, %c0_19], %30 {strides = array<i32>} : memref<16x8xf32, #tpu.memory_space<vmem>>, vector<16x8xf32>,
    } else {
    }
    %c16_i32 = arith.constant 16 : i32
    %5 = arith.muli %arg3, %c16_i32 : i32
    %c8_i32 = arith.constant 8 : i32
    %6 = arith.muli %arg2, %c8_i32 : i32
    %7 = arith.addi %0, %6 : i32
    %c8_i32_1 = arith.constant 8 : i32
    %8 = arith.addi %7, %c8_i32_1 : i32
    %c1_i32 = arith.constant 1 : i32
    %9 = arith.subi %8, %c1_i32 : i32
    %10 = arith.cmpi slt, %5, %1 : i32
    %11 = arith.cmpi sle, %5, %9 : i32
    %12 = arith.andi %10, %11 : i1
    %13 = arith.extui %12 : i1 to i32
    %c0_i32_2 = arith.constant 0 : i32
    %14 = arith.cmpi ne, %13, %c0_i32_2 : i32
    scf.if %14 {
      %c0_5 = arith.constant 0 : index
      %c0_6 = arith.constant 0 : index
      %c0_7 = arith.constant 0 : index
      %c0_8 = arith.constant 0 : index
      %18 = vector.load %arg6[%c0_5, %c0_6, %c0_7, %c0_8] : memref<1x1x16x8xbf16, #tpu.memory_space<vmem>>, vector<1x1x16x8xbf16>
      %19 = vector.shape_cast %18 : vector<1x1x16x8xbf16> to vector<16x8xbf16>
      %c0_9 = arith.constant 0 : index
      %c0_10 = arith.constant 0 : index
      %c0_11 = arith.constant 0 : index
      %c0_12 = arith.constant 0 : index
      %20 = vector.load %arg7[%c0_9, %c0_10, %c0_11, %c0_12] : memref<1x1x16x8xbf16, #tpu.memory_space<vmem>>, vector<1x1x16x8xbf16>
      %21 = vector.shape_cast %20 : vector<1x1x16x8xbf16> to vector<16x8xbf16>
      %c0_13 = arith.constant 0 : index
      %c0_14 = arith.constant 0 : index
      %22 = vector.load %arg9[%c0_13, %c0_14] : memref<16x8xbf16, #tpu.memory_space<vmem>>, vector<16x8xbf16>
      %cst = arith.constant dense<0.000000e+00> : vector<16x16xf32>
      %23 = tpu.matmul %22, %19, %cst {dimension_numbers = #tpu.dot_dimension_numbers<[1], [1], [0], [0], [0, 0, 1, 0], [], []>} : vector<16x8xbf16>, vector<16x8xbf16>, vector<16x16xf32> -> vector<16x16xf32>
      %c16_i32_15 = arith.constant 16 : i32
      %24 = arith.addi %5, %c16_i32_15 : i32
      %c1_i32_16 = arith.constant 1 : i32
      %25 = arith.addi %7, %c1_i32_16 : i32
      %26 = arith.cmpi sle, %24, %25 : i32
      %c16_i32_17 = arith.constant 16 : i32
      %27 = arith.addi %5, %c16_i32_17 : i32
      %28 = arith.cmpi sle, %27, %1 : i32
      %29 = arith.andi %26, %28 : i1
      %30 = arith.extui %29 : i1 to i32
      %c0_i32_18 = arith.constant 0 : i32
      %31 = arith.cmpi ne, %30, %c0_i32_18 : i32
      scf.if %31 {
        %c0_20 = arith.constant 0 : index
        %c0_21 = arith.constant 0 : index
        %35 = vector.load %arg10[%c0_20, %c0_21] : memref<16x1xf32, #tpu.memory_space<vmem>>, vector<16x1xf32>
        %cst_22 = arith.constant dense<0xFF800000> : vector<16xf32>
        %36 = vector.multi_reduction <maximumf>, %23, %cst_22 [1] : vector<16x16xf32> to vector<16xf32>
        %37 = vector.shape_cast %36 : vector<16xf32> to vector<16x1xf32>
        %38 = arith.maximumf %35, %37 : vector<16x1xf32>
        %39 = arith.subf %35, %38 : vector<16x1xf32>
        %40 = math.exp %39 : vector<16x1xf32>
        %41 = vector.broadcast %38 : vector<16x1xf32> to vector<16x16xf32>
        %42 = arith.subf %23, %41 : vector<16x16xf32>
        %43 = math.exp %42 : vector<16x16xf32>
        %c0_23 = arith.constant 0 : index
        %c0_24 = arith.constant 0 : index
        %44 = vector.load %arg11[%c0_23, %c0_24] : memref<16x1xf32, #tpu.memory_space<vmem>>, vector<16x1xf32>
        %45 = arith.mulf %40, %44 : vector<16x1xf32>
        %cst_25 = arith.constant dense<0.000000e+00> : vector<16xf32>
        %46 = vector.multi_reduction <add>, %43, %cst_25 [1] : vector<16x16xf32> to vector<16xf32>
        %47 = vector.shape_cast %46 : vector<16xf32> to vector<16x1xf32>
        %48 = arith.addf %45, %47 : vector<16x1xf32>
        %c0_26 = arith.constant 0 : index
        %c0_27 = arith.constant 0 : index
        %49 = vector.load %arg11[%c0_26, %c0_27] : memref<16x1xf32, #tpu.memory_space<vmem>>, vector<16x1xf32>
        tpu.vector_store %arg11[%c0_26, %c0_27], %48 {strides = array<i32>} : memref<16x1xf32, #tpu.memory_space<vmem>>, vector<16x1xf32>,
        %c0_28 = arith.constant 0 : index
        %c0_29 = arith.constant 0 : index
        %50 = vector.load %arg12[%c0_28, %c0_29] : memref<16x8xf32, #tpu.memory_space<vmem>>, vector<16x8xf32>
        %51 = vector.broadcast %40 : vector<16x1xf32> to vector<16x8xf32>
        %52 = arith.mulf %51, %50 : vector<16x8xf32>
        %53 = arith.truncf %43 : vector<16x16xf32> to vector<16x16xbf16>
        %cst_30 = arith.constant dense<0.000000e+00> : vector<16x8xf32>
        %54 = tpu.matmul %53, %21, %cst_30 {dimension_numbers = #tpu.dot_dimension_numbers<[1], [0], [0], [1], [0, 0, 1, 1], [], []>} : vector<16x16xbf16>, vector<16x8xbf16>, vector<16x8xf32> -> vector<16x8xf32>
        %55 = arith.addf %52, %54 : vector<16x8xf32>
        %c0_31 = arith.constant 0 : index
        %c0_32 = arith.constant 0 : index
        %56 = vector.load %arg12[%c0_31, %c0_32] : memref<16x8xf32, #tpu.memory_space<vmem>>, vector<16x8xf32>
        tpu.vector_store %arg12[%c0_31, %c0_32], %55 {strides = array<i32>} : memref<16x8xf32, #tpu.memory_space<vmem>>, vector<16x8xf32>,
        %c0_33 = arith.constant 0 : index
        %c0_34 = arith.constant 0 : index
        %57 = vector.load %arg10[%c0_33, %c0_34] : memref<16x1xf32, #tpu.memory_space<vmem>>, vector<16x1xf32>
        tpu.vector_store %arg10[%c0_33, %c0_34], %38 {strides = array<i32>} : memref<16x1xf32, #tpu.memory_space<vmem>>, vector<16x1xf32>,
      } else {
      }
      %true = arith.constant true
      %32 = arith.xori %29, %true : i1
      %33 = arith.extui %32 : i1 to i32
      %c0_i32_19 = arith.constant 0 : i32
      %34 = arith.cmpi ne, %33, %c0_i32_19 : i32
      scf.if %34 {
        %35 = tpu.iota {dimensions = array<i32: 1>} : vector<2x8x16xi32>
        %36 = vector.shape_cast %35 : vector<2x8x16xi32> to vector<16x16xi32>
        %37 = vector.broadcast %7 : i32 to vector<16x16xi32>
        %38 = arith.addi %36, %37 : vector<16x16xi32>
        %39 = tpu.iota {dimensions = array<i32: 1>} : vector<16x16xi32>
        %40 = vector.broadcast %5 : i32 to vector<16x16xi32>
        %41 = arith.addi %39, %40 : vector<16x16xi32>
        %42 = arith.cmpi sle, %41, %38 : vector<16x16xi32>
        %43 = vector.broadcast %1 : i32 to vector<16x16xi32>
        %44 = arith.cmpi slt, %41, %43 : vector<16x16xi32>
        %45 = arith.andi %42, %44 : vector<16x16xi1>
        %c0_20 = arith.constant 0 : index
        %c0_21 = arith.constant 0 : index
        %46 = vector.load %arg10[%c0_20, %c0_21] : memref<16x1xf32, #tpu.memory_space<vmem>>, vector<16x1xf32>
        %cst_22 = arith.constant -1.000000e+30 : f32
        %47 = vector.broadcast %cst_22 : f32 to vector<16x16xf32>
        %48 = arith.select %45, %23, %47 : vector<16x16xi1>, vector<16x16xf32>
        %cst_23 = arith.constant dense<0xFF800000> : vector<16xf32>
        %49 = vector.multi_reduction <maximumf>, %48, %cst_23 [1] : vector<16x16xf32> to vector<16xf32>
        %50 = vector.shape_cast %49 : vector<16xf32> to vector<16x1xf32>
        %51 = arith.maximumf %46, %50 : vector<16x1xf32>
        %52 = arith.subf %46, %51 : vector<16x1xf32>
        %53 = math.exp %52 : vector<16x1xf32>
        %54 = vector.broadcast %51 : vector<16x1xf32> to vector<16x16xf32>
        %55 = arith.subf %23, %54 : vector<16x16xf32>
        %56 = math.exp %55 : vector<16x16xf32>
        %cst_24 = arith.constant 0.000000e+00 : f32
        %57 = vector.broadcast %cst_24 : f32 to vector<16x16xf32>
        %58 = arith.select %45, %56, %57 : vector<16x16xi1>, vector<16x16xf32>
        %c0_25 = arith.constant 0 : index
        %c0_26 = arith.constant 0 : index
        %59 = vector.load %arg11[%c0_25, %c0_26] : memref<16x1xf32, #tpu.memory_space<vmem>>, vector<16x1xf32>
        %60 = arith.mulf %53, %59 : vector<16x1xf32>
        %cst_27 = arith.constant dense<0.000000e+00> : vector<16xf32>
        %61 = vector.multi_reduction <add>, %58, %cst_27 [1] : vector<16x16xf32> to vector<16xf32>
        %62 = vector.shape_cast %61 : vector<16xf32> to vector<16x1xf32>
        %63 = arith.addf %60, %62 : vector<16x1xf32>
        %c0_28 = arith.constant 0 : index
        %c0_29 = arith.constant 0 : index
        %64 = vector.load %arg11[%c0_28, %c0_29] : memref<16x1xf32, #tpu.memory_space<vmem>>, vector<16x1xf32>
        tpu.vector_store %arg11[%c0_28, %c0_29], %63 {strides = array<i32>} : memref<16x1xf32, #tpu.memory_space<vmem>>, vector<16x1xf32>,
        %c0_30 = arith.constant 0 : index
        %c0_31 = arith.constant 0 : index
        %65 = vector.load %arg12[%c0_30, %c0_31] : memref<16x8xf32, #tpu.memory_space<vmem>>, vector<16x8xf32>
        %66 = vector.broadcast %53 : vector<16x1xf32> to vector<16x8xf32>
        %67 = arith.mulf %66, %65 : vector<16x8xf32>
        %68 = arith.truncf %58 : vector<16x16xf32> to vector<16x16xbf16>
        %cst_32 = arith.constant dense<0.000000e+00> : vector<16x8xf32>
        %69 = tpu.matmul %68, %21, %cst_32 {dimension_numbers = #tpu.dot_dimension_numbers<[1], [0], [0], [1], [0, 0, 1, 1], [], []>} : vector<16x16xbf16>, vector<16x8xbf16>, vector<16x8xf32> -> vector<16x8xf32>
        %70 = arith.addf %67, %69 : vector<16x8xf32>
        %c0_33 = arith.constant 0 : index
        %c0_34 = arith.constant 0 : index
        %71 = vector.load %arg12[%c0_33, %c0_34] : memref<16x8xf32, #tpu.memory_space<vmem>>, vector<16x8xf32>
        tpu.vector_store %arg12[%c0_33, %c0_34], %70 {strides = array<i32>} : memref<16x8xf32, #tpu.memory_space<vmem>>, vector<16x8xf32>,
        %c0_35 = arith.constant 0 : index
        %c0_36 = arith.constant 0 : index
        %72 = vector.load %arg10[%c0_35, %c0_36] : memref<16x1xf32, #tpu.memory_space<vmem>>, vector<16x1xf32>
        tpu.vector_store %arg10[%c0_35, %c0_36], %51 {strides = array<i32>} : memref<16x1xf32, #tpu.memory_space<vmem>>, vector<16x1xf32>,
      } else {
      }
    } else {
    }
    %c0_i32_3 = arith.constant 0 : i32
    %15 = arith.cmpi eq, %arg3, %c0_i32_3 : i32
    %16 = arith.extui %15 : i1 to i32
    %c0_i32_4 = arith.constant 0 : i32
    %17 = arith.cmpi ne, %16, %c0_i32_4 : i32
    scf.if %17 {
      %c0_5 = arith.constant 0 : index
      %c0_6 = arith.constant 0 : index
      %18 = vector.load %arg12[%c0_5, %c0_6] : memref<16x8xf32, #tpu.memory_space<vmem>>, vector<8x8xf32>
      %c0_7 = arith.constant 0 : index
      %c0_8 = arith.constant 0 : index
      %19 = vector.load %arg11[%c0_7, %c0_8] : memref<16x1xf32, #tpu.memory_space<vmem>>, vector<8x1xf32>
      %20 = vector.broadcast %19 : vector<8x1xf32> to vector<8x8xf32>
      %21 = arith.divf %18, %20 : vector<8x8xf32>
      %22 = arith.truncf %21 : vector<8x8xf32> to vector<8x8xbf16>
      %c0_9 = arith.constant 0 : index
      %c0_10 = arith.constant 0 : index
      %c0_11 = arith.constant 0 : index
      %c0_12 = arith.constant 0 : index
      %23 = vector.load %arg8[%c0_9, %c0_10, %c0_11, %c0_12] : memref<1x1x8x16xbf16, #tpu.memory_space<vmem>>, vector<1x1x8x8xbf16>
      %24 = vector.shape_cast %23 : vector<1x1x8x8xbf16> to vector<8x8xbf16>
      %25 = vector.shape_cast %22 : vector<8x8xbf16> to vector<1x1x8x8xbf16>
      tpu.vector_store %arg8[%c0_9, %c0_10, %c0_11, %c0_12], %25 {strides = array<i32>} : memref<1x1x8x16xbf16, #tpu.memory_space<vmem>>, vector<1x1x8x8xbf16>,
      %c8 = arith.constant 8 : index
      %c0_13 = arith.constant 0 : index
      %26 = vector.load %arg12[%c8, %c0_13] : memref<16x8xf32, #tpu.memory_space<vmem>>, vector<8x8xf32>
      %c8_14 = arith.constant 8 : index
      %c0_15 = arith.constant 0 : index
      %27 = vector.load %arg11[%c8_14, %c0_15] : memref<16x1xf32, #tpu.memory_space<vmem>>, vector<8x1xf32>
      %28 = vector.broadcast %27 : vector<8x1xf32> to vector<8x8xf32>
      %29 = arith.divf %26, %28 : vector<8x8xf32>
      %30 = arith.truncf %29 : vector<8x8xf32> to vector<8x8xbf16>
      %c0_16 = arith.constant 0 : index
      %c0_17 = arith.constant 0 : index
      %c0_18 = arith.constant 0 : index
      %c8_19 = arith.constant 8 : index
      %31 = vector.load %arg8[%c0_16, %c0_17, %c0_18, %c8_19] : memref<1x1x8x16xbf16, #tpu.memory_space<vmem>>, vector<1x1x8x8xbf16>
      %32 = vector.shape_cast %31 : vector<1x1x8x8xbf16> to vector<8x8xbf16>
      %33 = vector.shape_cast %30 : vector<8x8xbf16> to vector<1x1x8x8xbf16>
      tpu.vector_store %arg8[%c0_16, %c0_17, %c0_18, %c8_19], %33 {strides = array<i32>} : memref<1x1x8x16xbf16, #tpu.memory_space<vmem>>, vector<1x1x8x8xbf16>,
    } else {
    }
    return
  }
  func.func @transform_0(%arg0: i32, %arg1: i32, %arg2: i32, %arg3: i32, %arg4: memref<2xi32, #tpu.memory_space<smem>>) -> (i32, i32, i32, i32) {
    %c0_i32 = arith.constant 0 : i32
    %c0_i32_0 = arith.constant 0 : i32
    return %arg0, %arg1, %arg2, %c0_i32 : i32, i32, i32, i32
  }
  func.func @transform_1(%arg0: i32, %arg1: i32, %arg2: i32, %arg3: i32, %arg4: memref<2xi32, #tpu.memory_space<smem>>) -> (i32, i32, i32, i32) {
    %c1 = arith.constant 1 : index
    %0 = memref.load %arg4[%c1] : memref<2xi32, #tpu.memory_space<smem>>
    %c0 = arith.constant 0 : index
    %1 = memref.load %arg4[%c0] : memref<2xi32, #tpu.memory_space<smem>>
    %c1_i32 = arith.constant 1 : i32
    %2 = arith.addi %arg2, %c1_i32 : i32
    %c8_i32 = arith.constant 8 : i32
    %3 = arith.muli %2, %c8_i32 : i32
    %4 = arith.addi %1, %3 : i32
    %5 = arith.minsi %0, %4 : i32
    %c1_i32_0 = arith.constant 1 : i32
    %6 = arith.subi %5, %c1_i32_0 : i32
    %c16_i32 = arith.constant 16 : i32
    %7 = arith.divsi %6, %c16_i32 : i32
    %8 = arith.minsi %arg3, %7 : i32
    %c0_i32 = arith.constant 0 : i32
    %c0_i32_1 = arith.constant 0 : i32
    return %arg0, %arg1, %8, %c0_i32 : i32, i32, i32, i32
  }
  func.func @transform_2(%arg0: i32, %arg1: i32, %arg2: i32, %arg3: i32, %arg4: memref<2xi32, #tpu.memory_space<smem>>) -> (i32, i32, i32, i32) {
    %c1 = arith.constant 1 : index
    %0 = memref.load %arg4[%c1] : memref<2xi32, #tpu.memory_space<smem>>
    %c0 = arith.constant 0 : index
    %1 = memref.load %arg4[%c0] : memref<2xi32, #tpu.memory_space<smem>>
    %c1_i32 = arith.constant 1 : i32
    %2 = arith.addi %arg2, %c1_i32 : i32
    %c8_i32 = arith.constant 8 : i32
    %3 = arith.muli %2, %c8_i32 : i32
    %4 = arith.addi %1, %3 : i32
    %5 = arith.minsi %0, %4 : i32
    %c1_i32_0 = arith.constant 1 : i32
    %6 = arith.subi %5, %c1_i32_0 : i32
    %c16_i32 = arith.constant 16 : i32
    %7 = arith.divsi %6, %c16_i32 : i32
    %8 = arith.minsi %arg3, %7 : i32
    %c0_i32 = arith.constant 0 : i32
    %c0_i32_1 = arith.constant 0 : i32
    return %arg0, %arg1, %8, %c0_i32 : i32, i32, i32, i32
  }
  func.func @transform_3(%arg0: i32, %arg1: i32, %arg2: i32, %arg3: i32, %arg4: memref<2xi32, #tpu.memory_space<smem>>) -> (i32, i32, i32, i32) {
    %c0_i32 = arith.constant 0 : i32
    %c0_i32_0 = arith.constant 0 : i32
    return %arg0, %arg1, %arg2, %c0_i32 : i32, i32, i32, i32
  }
}

module attributes {stable_mosaic.version = 11 : i64} {
  func.func @_matmul_kernel(%arg0: i32, %arg1: i32, %arg2: i32, %arg3: memref<16x32xbf16, #tpu.memory_space<vmem>>, %arg4: memref<32x32xbf16, #tpu.memory_space<vmem>>, %arg5: memref<16x32xf32, #tpu.memory_space<vmem>>, %arg6: memref<16x32xf32, #tpu.memory_space<vmem>>) attributes {dimension_semantics = [#tpu.dimension_semantics<parallel>, #tpu.dimension_semantics<parallel>, #tpu.dimension_semantics<arbitrary>], iteration_bounds = array<i64: 1, 1, 1>, scalar_prefetch = 0 : i64, scratch_operands = 1 : i64, tpu.core_type = #tpu.core_type<tc>, window_params = [{transform_indices = @transform_0, window_bounds = array<i64: 16, 32>}, {transform_indices = @transform_1, window_bounds = array<i64: 32, 32>}, {transform_indices = @transform_2, window_bounds = array<i64: 16, 32>}]} {
    %c0_i32 = arith.constant 0 : i32
    %0 = arith.cmpi eq, %arg2, %c0_i32 : i32
    %1 = arith.extui %0 : i1 to i32
    %c0_i32_0 = arith.constant 0 : i32
    %2 = arith.cmpi ne, %1, %c0_i32_0 : i32
    scf.if %2 {
      %cst_10 = arith.constant 0.000000e+00 : f32
      %12 = vector.broadcast %cst_10 : f32 to vector<16x32xf32>
      %c0_11 = arith.constant 0 : index
      %c0_12 = arith.constant 0 : index
      %13 = vector.load %arg6[%c0_11, %c0_12] : memref<16x32xf32, #tpu.memory_space<vmem>>, vector<16x32xf32>
      tpu.vector_store %arg6[%c0_11, %c0_12], %12 {strides = array<i32>} : memref<16x32xf32, #tpu.memory_space<vmem>>, vector<16x32xf32>,
    } else {
    }
    %c0 = arith.constant 0 : index
    %c0_1 = arith.constant 0 : index
    %3 = vector.load %arg6[%c0, %c0_1] : memref<16x32xf32, #tpu.memory_space<vmem>>, vector<16x32xf32>
    %c0_2 = arith.constant 0 : index
    %c0_3 = arith.constant 0 : index
    %4 = vector.load %arg3[%c0_2, %c0_3] : memref<16x32xbf16, #tpu.memory_space<vmem>>, vector<16x32xbf16>
    %c0_4 = arith.constant 0 : index
    %c0_5 = arith.constant 0 : index
    %5 = vector.load %arg4[%c0_4, %c0_5] : memref<32x32xbf16, #tpu.memory_space<vmem>>, vector<32x32xbf16>
    %cst = arith.constant dense<0.000000e+00> : vector<16x32xf32>
    %6 = tpu.matmul %4, %5, %cst {dimension_numbers = #tpu.dot_dimension_numbers<[1], [0], [0], [1], [0, 0, 1, 1], [], []>} : vector<16x32xbf16>, vector<32x32xbf16>, vector<16x32xf32> -> vector<16x32xf32>
    %7 = arith.addf %3, %6 : vector<16x32xf32>
    %c0_6 = arith.constant 0 : index
    %c0_7 = arith.constant 0 : index
    %8 = vector.load %arg6[%c0_6, %c0_7] : memref<16x32xf32, #tpu.memory_space<vmem>>, vector<16x32xf32>
    tpu.vector_store %arg6[%c0_6, %c0_7], %7 {strides = array<i32>} : memref<16x32xf32, #tpu.memory_space<vmem>>, vector<16x32xf32>,
    %c0_i32_8 = arith.constant 0 : i32
    %9 = arith.cmpi eq, %arg2, %c0_i32_8 : i32
    %10 = arith.extui %9 : i1 to i32
    %c0_i32_9 = arith.constant 0 : i32
    %11 = arith.cmpi ne, %10, %c0_i32_9 : i32
    scf.if %11 {
      %c0_10 = arith.constant 0 : index
      %c0_11 = arith.constant 0 : index
      %12 = vector.load %arg6[%c0_10, %c0_11] : memref<16x32xf32, #tpu.memory_space<vmem>>, vector<16x32xf32>
      %c0_12 = arith.constant 0 : index
      %c0_13 = arith.constant 0 : index
      %13 = vector.load %arg5[%c0_12, %c0_13] : memref<16x32xf32, #tpu.memory_space<vmem>>, vector<16x32xf32>
      tpu.vector_store %arg5[%c0_12, %c0_13], %12 {strides = array<i32>} : memref<16x32xf32, #tpu.memory_space<vmem>>, vector<16x32xf32>,
    } else {
    }
    return
  }
  func.func @transform_0(%arg0: i32, %arg1: i32, %arg2: i32) -> (i32, i32) {
    %c0_i32 = arith.constant 0 : i32
    return %arg0, %arg2 : i32, i32
  }
  func.func @transform_1(%arg0: i32, %arg1: i32, %arg2: i32) -> (i32, i32) {
    %c0_i32 = arith.constant 0 : i32
    return %arg2, %arg1 : i32, i32
  }
  func.func @transform_2(%arg0: i32, %arg1: i32, %arg2: i32) -> (i32, i32) {
    %c0_i32 = arith.constant 0 : i32
    return %arg0, %arg1 : i32, i32
  }
}

</mosaic_0001>

<bundles_post_ra>
// kernel: attention_forward.3
= control target key start
LH: loop header
LB: loop body
LE: loop exit
PB: predicated region body
PF: predicated region fallthrough
CT: control target
= control target key end

     0   :  { %vm16_vm0 = vcmask 523264   ;;  %v138_v0 = vmov 0.0   ;;  %vm139_vm1 = vmmov 0   ;;  %vm44_vm2 = vcmask 261120   ;;  %s174_s1 = inlined_call_operand.vmem [shape: bf16[32,64], index: 1, kind: input, shape index: {}]   ;;  %s175_s0 = inlined_call_operand.vmem [shape: bf16[16,32], index: 0, kind: input, shape index: {}]   ;;  %s176_s2 = inlined_call_operand.vmem [shape: bf16[16,64], index: 2, kind: output, shape index: {}]  }
   0x1   :  { %125 = vmatprep.subr.bf16.mxu0 %v138_v0  ;;  %v135_v1 = vld [vmem:[%s174_s1 + $0x8] sm:$0xff]   ;;  %129 = vmatprep.mubr.msk.bf16.mxu0 %vm139_vm1, %v138_v0  ;;  %17 = vst.msk [vmem:[#allocation2] sm:$0xff] %vm16_vm0, %v138_v0  ;;  %18 = vst.msk [vmem:[#allocation2 + $0x8] sm:$0xff] %vm16_vm0, %v138_v0  ;;  %v136_v2 = vld [vmem:[%s174_s1] sm:$0xff]   ;;  %vm107_vm3 = vcmask 519168  }
   0x2   :  { %126 = vmatpush3.bf16.msra.mxu0 %v135_v1  ;;  %v137_v3 = vld [vmem:[%s175_s0] sm:$0xff]  }
   0x3   :  { %127 = vmatprep.subr.bf16.mxu0 %v138_v0 }
   0x6   :  { %128 = vmatpush3.bf16.msra.mxu0 %v136_v2 }
   0x8   :  { %v19_v4 = vld [vmem:[#allocation2] sm:$0xff]  ;;  %v20_v8 = vld [vmem:[#allocation2 + $0x8] sm:$0xff] }
   0x9   :  { %130 = vmatmul.mubr.msk.bf16.vlgmr.msra.gmra.mxu0 %vm44_vm2, %v137_v3 }
  0xc9   :  { %v82_v5 = vpop.f32.mrf.mxu0 }
  0xca   :  { %v89_v6 = vadd.f32 %v82_v5, %v19_v4 }
  0xcb   :  { %v131_v7 = vpop.f32.mrf.mxu0 }
  0xcc   :  { %92 = vst.msk [vmem:[#allocation2] sm:$0xff] %vm16_vm0, %v89_v6 }
  0xcd   :  { %v85_v9 = vpop.f32.mrf.mxu0 }
  0xce   :  { %v90_v10 = vadd.f32 %v85_v9, %v20_v8 }
  0xcf   :  { %v132_v11 = vpop.f32.mrf.mxu0 }
  0xd0   :  { %93 = vst.msk [vmem:[#allocation2 + $0x8] sm:$0xff] %vm16_vm0, %v90_v10 }
  0xd3   :  { %v97_v12 = vld [vmem:[#allocation2] sm:$0xff] }
  0xd4   :  { %v120_v13 = vpack.c.bf16 %v97_v12, %v97_v12 }
  0xd6   :  { %108 = vst.msk [vmem:[%s176_s2] sm:$0xf] %vm107_vm3, %v120_v13 }
  0xd7   :  { %v98_v14 = vld [vmem:[#allocation2 + $0x8] sm:$0xff] }
  0xd8   :  { %v121_v15 = vpack.c.bf16 %v98_v14, %v98_v14 }
  0xda   :  { %109 = vst.msk [vmem:[%s176_s2 + $0x4] sm:$0xf] %vm107_vm3, %v121_v15 }

// kernel: attention_forward.5
= control target key start
LH: loop header
LB: loop body
LE: loop exit
PB: predicated region body
PF: predicated region fallthrough
CT: control target
= control target key end

     0   :  { %v162_v1 = vmov 0.0   ;;  %vm163_vm0 = vmmov 0   ;;  %vm17_vm1 = vcmask 261120   ;;  %s201_s0 = inlined_call_operand.vmem [shape: bf16[16,32], index: 0, kind: input, shape index: {}]   ;;  %s202_s1 = inlined_call_operand.vmem [shape: bf16[32,32], index: 1, kind: input, shape index: {}]   ;;  %s203_s2 = inlined_call_operand.hbm [shape: f32[16,32], index: 2, kind: output, shape index: {}]  }
   0x1   :  { %v137_v0 = vld [vmem:[%s202_s1 + $0x8] sm:$0xff]   ;;  %124 = vmatprep.subr.bf16.mxu0 %v162_v1  ;;  %v138_v2 = vld [vmem:[%s202_s1] sm:$0xff]   ;;  %128 = vmatprep.mubr.msk.bf16.mxu0 %vm163_vm0, %v162_v1  ;;  %18 = vst.msk [vmem:[#allocation2] sm:$0xff] %vm17_vm1, %v162_v1  ;;  %19 = vst.msk [vmem:[#allocation2 + $0x8] sm:$0xff] %vm17_vm1, %v162_v1 }
   0x2   :  { %125 = vmatpush3.bf16.msra.mxu0 %v137_v0 }
   0x3   :  { %126 = vmatprep.subr.bf16.mxu0 %v162_v1 }
   0x4   :  { %7 = vsyncpa [#allocation4], 0  ;;  %v139_v3 = vld [vmem:[%s201_s0] sm:$0xff]   ;;  %s164_s1 = smov [#allocation3]  }
   0x5   :  { %s106_s15 = sshll.u32 %s164_s1, 4  ;;  %s107_s15 = int_to_ptr.vmem [resolvable:$true] %s106_s15 }
   0x6   :  { %127 = vmatpush3.bf16.msra.mxu0 %v138_v2  ;;  %s140_s0 = scalar_lea.vmem %s107_s15, 256  ;;  %p145_p1 = scmp.lt.s32.totalorder %s107_s15, %s107_s15 }
   0x7   :  { %p141_p0 = scmp.ne.s32.totalorder %s107_s15, %s140_s0  ;;  %p146_p2 = scmp.lt.s32.totalorder %s140_s0, %s140_s0 }
   0x8   :  { %v20_v4 = vld [vmem:[#allocation2] sm:$0xff]  ;;  %v21_v8 = vld [vmem:[#allocation2 + $0x8] sm:$0xff] }
   0x9   :  { %129 = vmatmul.mubr.msk.bf16.vlgmr.msra.gmra.mxu0 %vm17_vm1, %v139_v3  ;;  %p147_p3 = por %p146_p2, %p145_p1 }
   0xb   :  { %p148_p4 = pnand %p147_p3, %p141_p0 }
  0xc9   :  { %v83_v5 = vpop.f32.mrf.mxu0 }
  0xca   :  { %v90_v6 = vadd.f32 %v83_v5, %v20_v4 }
  0xcb   :  { %v130_v7 = vpop.f32.mrf.mxu0 }
  0xcc   :  { %92 = vst.msk [vmem:[#allocation2] sm:$0xff] %vm17_vm1, %v90_v6 }
  0xcd   :  { %v86_v9 = vpop.f32.mrf.mxu0 }
  0xce   :  { %v91_v10 = vadd.f32 %v86_v9, %v21_v8 }
  0xcf   :  { %v131_v11 = vpop.f32.mrf.mxu0 }
  0xd0   :  { %93 = vst.msk [vmem:[#allocation2 + $0x8] sm:$0xff] %vm17_vm1, %v91_v10 }
  0xd3   :  { %v97_v12 = vld [vmem:[#allocation2] sm:$0xff] }
  0xd4   :  { %99 = vst.msk [vmem:[#allocation3] sm:$0xff] %vm17_vm1, %v97_v12 }
  0xd7   :  { %v98_v13 = vld [vmem:[#allocation2 + $0x8] sm:$0xff] }
  0xd8   :  { %100 = vst.msk [vmem:[#allocation3 + $0x8] sm:$0xff] %vm17_vm1, %v98_v13 }
  0xd9   :  { %151 = shalt.err (!%p148_p4)
}
  0xda   :  { %s165_s16 = smov 128   ;;  %s166_s17 = smov 8  }
  0xdb   :  { %112 = dma.vmem_to_hbm [thread:$0]  %s107_s15, 256, %s203_s2, [#allocation4], %s165_s16, %s165_s16, %s166_s17  }
  0xdc   :  { %160 = dma.done.wait [#allocation4], 256  }
  0xdd   :  { %161 = vsyncadd [#allocation4], 4294967040 }
  0xde   :  { %116 = vsyncpa [#allocation4], 1 }

// kernel: attention_forward.4
= control target key start
LH: loop header
LB: loop body
LE: loop exit
PB: predicated region body
PF: predicated region fallthrough
CT: control target
= control target key end

     0   :  { %s1565_s0 = inlined_call_operand.vmem [shape: s32[2], index: 0, kind: input, shape index: {}]   ;;  %s1566_s1 = inlined_call_operand.vmem [shape: bf16[2,4,8,8], index: 1, kind: input, shape index: {}]   ;;  %s1567_s2 = inlined_call_operand.vmem [shape: bf16[2,2,16,8], index: 2, kind: input, shape index: {}]   ;;  %s1568_s3 = inlined_call_operand.vmem [shape: bf16[2,2,16,8], index: 3, kind: input, shape index: {}]   ;;  %s1569_s4 = inlined_call_operand.vmem [shape: bf16[2,2,8,16], index: 4, kind: output, shape index: {}]  }
   0x1   :  { %s9_s17 = sshll.u32 %s1565_s0, 4  ;;  %s10_s17 = int_to_ptr.vmem [resolvable:$true] %s9_s17 }
   0x2   :  { %s1298_s18 = scalar_lea.vmem %s10_s17, 16  ;;  %p1303_p1 = scmp.lt.s32.totalorder %s10_s17, %s10_s17 }
   0x3   :  { %p1299_p0 = scmp.ne.s32.totalorder %s10_s17, %s1298_s18  ;;  %p1304_p2 = scmp.lt.s32.totalorder %s1298_s18, %s1298_s18 }
   0x5   :  { %p1305_p3 = por %p1304_p2, %p1303_p1 }
   0x7   :  { %p1306_p4 = pnand %p1305_p3, %p1299_p0 }
   0x9   :  { %1309 = shalt.err (!%p1306_p4)  }
   0xa   :  { %s1352_s19 = smov [#allocation7]  }
   0xb   :  { %12 = dma.vmem_to_smem %s10_s17, 16, %s1352_s19, [#allocation6] }
   0xc   :  { %1330 = dma.done.wait [#allocation6], 16 }
   0xd   :  { %1331 = vsyncadd [#allocation6], 4294967280 }
   0xe   :  { %14 = sfence }
   0xf   :  { %s1393_s20 = smov 0   ;;  %s1395_s21 = smov 0  }
  0x10   :  { %s1397_s22 = smov 0   ;;  %s1399_s0 = smov 0  }
  0x11   :  { %s1401_s23 = smov 0  }
  0x12 LB: > { %s42_s24 = sadd.s32 1, %s1342_s22  ;;  %s46_s25 = sadd.s32 1, %s1346_s0  ;;  %s1350_s23 = sphi %s1401_s23, %s20_s23   ;;  %s1346_s0 = sphi %s1399_s0, %s1577_s0   ;;  %s1342_s22 = sphi %s1397_s22, %s1576_s22   ;;  %s1338_s21 = sphi %s1395_s21, %s1575_s21   ;;  %s1334_s20 = sphi %s1393_s20, %s1574_s20  }
  0x13   : > { %p44_p5 = scmp.ge.s32.totalorder %s42_s24, 2  ;;  %p1148_p6 = scmp.ge.s32.totalorder %s1350_s23, 1 }
  0x14   : > { %p360_p7 = scmp.lt.s32.totalorder %s1350_s23, 5 }
  0x15   : > { %s1579_s24 = smov (%p44_p5, %s42_s24), 0  ;;  %s1581_s25 = smov (!%p44_p5, %s46_s25), %s1346_s0 }
  0x16   : > { %p361_p8 = pnand %p1148_p6, %p360_p7  ;;  %p48_p9 = scmp.ge.s32.totalorder %s1581_s25, 2 }
  0x17   : > { %s1149_s26 = sshll.u32 (!%p361_p8), %s1334_s20, 1  ;;  %p456_p10 = scmp.lt.s32.totalorder (!%p361_p8), %s1338_s21, 1 }
  0x18   : > { %s1583_s25 = smov (%p48_p9, %s1581_s25), 0  ;;  %364 = sbr.rel (%p361_p8) target bundleno = 1514 (0x5ea), region = 32 }
  0x19   : > { %p458_p11 = scmp.lt.s32.totalorder (!%p361_p8), %s1149_s26, 3  ;;  %s1426_s27 = sld [smem:[#allocation7 + $0x1]] (!%p361_p8) }
  0x1a   : > { %s1437_s29 = sld [smem:[#allocation7]] (!%p361_p8)  ;;  %p487_p12 = scmp.lt.s32.totalorder (!%p361_p8), %s1334_s20, 1 }
  0x1d   : > { %vm595_vm0 = vcmask 7168   ;;  %v1353_v0 = vmov -1e+30   ;;  %vm600_vm1 = vcmask 64512   ;;  %s1585_s21 = smov (!%p456_p10, %s1338_s21), 1  ;;  %v1354_v1 = vmov 0.0  }
  0x1e   : > { %596 = vst.msk [vmem:[#allocation3] sm:$0xff] %vm595_vm0, %v1353_v0  ;;  %597 = vst.msk [vmem:[#allocation3 + $0x8] sm:$0xff] %vm595_vm0, %v1353_v0  ;;  %s1587_s26 = smov (!%p458_p11, %s1149_s26), 3  ;;  %s1150_s28 = sshll.u32 %s1585_s21, 2  ;;  %vm592_vm2 = vcmask 60416  }
  0x1f   : > { %598 = vst.msk [vmem:[#allocation4] sm:$0xff] %vm595_vm0, %v1354_v1  ;;  %599 = vst.msk [vmem:[#allocation4 + $0x8] sm:$0xff] %vm595_vm0, %v1354_v1  ;;  %s464_s30 = sadd.s32 %s1150_s28, %s1587_s26  ;;  %s1168_s9 = sshll.u32 %s1585_s21, 1 }
  0x20   : > { %601 = vst.msk [vmem:[#allocation5] sm:$0xff] %vm600_vm1, %v1354_v1  ;;  %602 = vst.msk [vmem:[#allocation5 + $0x8] sm:$0xff] %vm600_vm1, %v1354_v1  ;;  %s1151_s5 = sshll.u32 %s464_s30, 2  ;;  %s1589_s20 = smov (!%p487_p12, %s1334_s20), 1 }
  0x21   : > { %s466_s8 = scalar_lea.vmem %s1566_s1, %s1151_s5  ;;  %s472_s10 = sadd.s32 8, %s1437_s29 }
  0x22   : > { %v1191_v2 = vld [vmem:[%s466_s8] sm:$0xff]   ;;  %p1173_p13 = scmp.gt.s32.totalorder %s1426_s27, 0  ;;  %p473_p0 = scmp.lt.s32.totalorder %s1426_s27, %s472_s10 }
  0x23   : > { %v1192_v3 = vunpack.c.l.bf16 %v1191_v2  ;;  %v1193_v4 = vunpack.c.h.bf16 %v1191_v2  ;;  %s568_s11 = sadd.s32 %s1168_s9, %s1589_s20  ;;  %s606_s13 = sadd.s32 7, %s1437_s29 }
  0x24   : > { %s1169_s12 = sshll.u32 %s568_s11, 2  ;;  %p1174_p1 = scmp.ge.s32.totalorder %s606_s13, 0 }
  0x25   : > { %v582_v5 = vmul.f32 0.35355338, %v1192_v3  ;;  %v583_v6 = vmul.f32 0.35355338, %v1193_v4  ;;  %s474_s14 = scalar_select %p473_p0, %s1426_s27, %s472_s10 }
  0x26   : > { %s1458_s17 = scalar_lea.vmem %s1569_s4, %s1169_s12  ;;  %p1464_p3 = pnand %p1174_p1, %p1173_p13 }
  0x27   : > { %v1187_v7 = vpack.c.bf16 %v582_v5, %v582_v5  ;;  %v1188_v8 = vpack.c.bf16 %v583_v6, %v583_v6  ;;  %s1153_s18 = sadd.s32 4294967295, %s474_s14  ;;  %s1157_s8 = sshll.u32 %s1589_s20, 1 }
  0x28   : > { %p476_p2 = scmp.lt.s32.totalorder %s1153_s18, 0  ;;  %s477_s19 = ssub.s32 0, %s1153_s18 }
  0x29   : > { %593 = vst.msk [vmem:[#allocation2] sm:$0xf] %vm592_vm2, %v1187_v7  ;;  %594 = vst.msk [vmem:[#allocation2 + $0x4] sm:$0xf] %vm592_vm2, %v1188_v8  ;;  %s1154_s26 = smin.u32 %s1153_s18, %s477_s19  ;;  %s678_s20 = sadd.s32 (!%p1464_p3), 1, %s1437_s29 }
  0x2a   : > { %s479_s5 = sshrl.u32 %s1154_s26, 4  ;;  %p1178_p6 = scmp.ge.s32.totalorder (!%p1464_p3), %s678_s20, 16 }
  0x2b   : > { %s480_s6 = ssub.s32 0, %s479_s5  ;;  %p1179_p7 = scmp.ge.s32.totalorder (!%p1464_p3), %s1426_s27, 16 }
  0x2c   : > { %s1591_s6 = smov (!%p476_p2, %s480_s6), %s479_s5 }
  0x2d   : > { %p1155_p4 = scmp.gt.s32.totalorder %s1591_s6, 0  ;;  %p1487_p8 = pnand (!%p1464_p3), %p1179_p7, %p1178_p6 }
  0x2f   : > { %s1593_s6 = smov (%p1155_p4, %s1591_s6), 0 }
  0x30   : > { %s1156_s7 = sshll.u32 %s1593_s6, 1 }
  0x31   : > { %p489_p5 = scmp.lt.s32.totalorder %s1156_s7, 1 }
  0x33   : > { %s1595_s7 = smov (!%p489_p5, %s1156_s7), 1  ;;  %612 = sbr.rel (%p1464_p3) target bundleno = 1254 (0x4e6), region = 40 }
  0x34   : > { %s492_s9 = sadd.s32 %s1157_s8, %s1595_s7 }
  0x35   : > { %s494_s10 = sadd.s32 %s1150_s28, %s492_s9 }
  0x36   : > { %s1159_s11 = sshll.u32 %s494_s10, 2 }
  0x37   : > { %s496_s14 = scalar_lea.vmem %s1567_s2, %s1159_s11  ;;  %s542_s18 = scalar_lea.vmem %s1568_s3, %s1159_s11 }
  0x38   : > { %v1479_v9 = vld [vmem:[%s542_s18] sm:$0xf]  ;;  %v1481_v10 = vld [vmem:[%s542_s18 + $0x4] sm:$0xf]  ;;  %v1355_v12 = vmov 0.0   ;;  %vm1356_vm3 = vmmov 0  }
  0x39   : > { %v1271_v11 = vld [vmem:[%s496_s14] sm:$0xff]   ;;  %1200 = vmatprep.subr.bf16.mxu0 %v1355_v12  ;;  %1202 = vmatprep.mubr.msk.bf16.mxu0 %vm1356_vm3, %v1355_v12 }
  0x3a   : > { %v634_v13 = vsel %vm600_vm1, %v1271_v11, 0  ;;  %v1272_v14 = vld [vmem:[#allocation2] sm:$0xff]  }
  0x3b   : > { %1201 = vmatpush3.bf16.xpose.msra.mxu0 %v634_v13 }
  0x42   : > { %1203 = vmatmul.mubr.msk.bf16.vlgmr.msra.gmra.mxu0 %vm600_vm1, %v1272_v14 }
 0x102   : > { %v1491_v15 = vpop.f32.mrf.mxu0 }
 0x104   : > { %v1204_v16 = vpop.f32.mrf.mxu0  ;;  %684 = sbr.rel (%p1487_p8) target bundleno = 755 (0x2f3), region = 44 }
 0x106   : > { %v1493_v17 = vpop.f32.mrf.mxu0 }
 0x108   : > { %v1205_v18 = vpop.f32.mrf.mxu0 }
 0x109   : > { %vm687_vm4 = vcmask 130048   ;;  %v1357_v21 = vmov 0   ;;  %v685_v22 = vld [vmem:[#allocation3] sm:$0xff]  ;;  %v686_v25 = vld [vmem:[#allocation3 + $0x8] sm:$0xff]  ;;  %v1180_v30 = vcombine.low %v1479_v9, %v1481_v10  ;;  %v1358_v31 = vmov 0.0   ;;  %v718_v47 = vld [vmem:[#allocation4] sm:$0xff] }
 0x10a   : > { %v688_v19 = vsel %vm687_vm4, %v1491_v15, -inf  ;;  %v691_v20 = vsel %vm687_vm4, %v1493_v17, -inf  ;;  %1273 = vset.pattern.permute.xlu1 %v1357_v21  ;;  %1274 = vset.pattern.permute.xlu0 %v1357_v21  ;;  %vm1359_vm5 = vmmov 0   ;;  %v719_v50 = vld [vmem:[#allocation4 + $0x8] sm:$0xff]  ;;  %v733_v55 = vld [vmem:[#allocation5] sm:$0xff]  ;;  %v734_v58 = vld [vmem:[#allocation5 + $0x8] sm:$0xff] }
 0x10b   : > { %689 = vmax.xlane.f32.xlu0 %v688_v19  ;;  %1206 = vmatprep.subr.bf16.mxu0 %v1358_v31 }
 0x10c   : > { %1208 = vmatprep.mubr.msk.bf16.mxu0 %vm1359_vm5, %v1358_v31  ;;  %1207 = vmatpush3.bf16.msra.mxu0 %v1180_v30 }
 0x10f   : > { %692 = vmax.xlane.f32.xlu0 %v691_v20 }
 0x194   : > { %v690_v23 = vpop.xlane.xlu0 %689 }
 0x195   : > { %v694_v24 = vmax.f32 %v685_v22, %v690_v23 }
 0x197   : > { %v696_v26 = vsub.f32 %v685_v22, %v694_v24  ;;  %802 = vst.msk [vmem:[#allocation3] sm:$0xff] %vm595_vm0, %v694_v24  ;;  %704 = vperm.xlu1 %1273, %v694_v24  }
 0x198   : > { %v693_v27 = vpop.xlane.xlu0 %692 }
 0x199   : > { %v695_v28 = vmax.f32 %v686_v25, %v693_v27  ;;  %v698_v44 = vmul.f32 1.442695, %v696_v26 }
 0x19b   : > { %v697_v29 = vsub.f32 %v686_v25, %v695_v28  ;;  %803 = vst.msk [vmem:[#allocation3 + $0x8] sm:$0xff] %vm595_vm0, %v695_v28  ;;  %709 = vperm.xlu1 %1273, %v695_v28  }
 0x19d   : > { %v700_v41 = vmul.f32 1.442695, %v697_v29 }
 0x212   : > { %v705_v32 = vpop.permute.xlu1 %704 }
 0x213   : > { %v712_v33 = vsub.f32 %v1491_v15, %v705_v32 }
 0x215   : > { %v714_v34 = vmul.f32 1.442695, %v712_v33 }
 0x216   : > { %v710_v35 = vpop.permute.xlu1 %709 }
 0x217   : > { %1275 = vpow2.f32 %v714_v34  ;;  %v713_v36 = vsub.f32 %v1493_v17, %v710_v35 }
 0x219   : > { %v716_v37 = vmul.f32 1.442695, %v713_v36 }
 0x21b   : > { %1277 = vpow2.f32 %v716_v37 }
 0x21c   : > { %1279 = vpow2.f32 %v700_v41 }
 0x21d   : > { %1281 = vpow2.f32 %v698_v44 }
 0x224   : > { %v1276_v38 = vpop.eup %1275 }
 0x225   : > { %v722_v39 = vsel %vm687_vm4, %v1276_v38, 0.0 }
 0x226   : > { %723 = vadd.xlane.f32.xlu0 %v722_v39 }
 0x228   : > { %v1278_v40 = vpop.eup %1277 }
 0x229   : > { %v725_v42 = vsel %vm687_vm4, %v1278_v40, 0.0  ;;  %v747_v43 = vpack.c.bf16 %v1278_v40, %v1276_v38  ;;  %v1280_v45 = vpop.eup %1279 }
 0x22a   : > { %726 = vadd.xlane.f32.xlu1 %v725_v42  ;;  %v1282_v46 = vpop.eup %1281  ;;  %v721_v52 = vmul.f32 %v1280_v45, %v719_v50 }
 0x22b   : > { %1209 = vmatmul.mubr.msk.bf16.vlgmr.msra.gmra.mxu0 %vm687_vm4, %v747_v43  ;;  %v720_v48 = vmul.f32 %v1282_v46, %v718_v47 }
 0x23b   : > { %742 = vperm.xlu1 %1273, %v1280_v45  }
 0x23c   : > { %737 = vperm.xlu0 %1274, %v1282_v46  }
 0x2af   : > { %v724_v49 = vpop.xlane.xlu0 %723 }
 0x2b0   : > { %v728_v51 = vadd.f32 %v724_v49, %v720_v48 }
 0x2b2   : > { %731 = vst.msk [vmem:[#allocation4] sm:$0xff] %vm595_vm0, %v728_v51 }
 0x2b3   : > { %v727_v53 = vpop.xlane.xlu1 %726 }
 0x2b4   : > { %v729_v54 = vadd.f32 %v727_v53, %v721_v52 }
 0x2b6   : > { %732 = vst.msk [vmem:[#allocation4 + $0x8] sm:$0xff] %vm595_vm0, %v729_v54 }
 0x2b7   : > { %v738_v56 = vpop.permute.xlu0 %737  ;;  %v743_v59 = vpop.permute.xlu1 %742 }
 0x2b8   : > { %v745_v57 = vmul.f32 %v738_v56, %v733_v55  ;;  %v746_v63 = vmul.f32 %v743_v59, %v734_v58 }
 0x2eb   : > { %v791_v60 = vpop.f32.mrf.mxu0 }
 0x2ec   : > { %v798_v61 = vadd.f32 %v791_v60, %v745_v57 }
 0x2ed   : > { %v1210_v62 = vpop.f32.mrf.mxu0 }
 0x2ee   : > { %800 = vst.msk [vmem:[#allocation5] sm:$0xff] %vm600_vm1, %v798_v61 }
 0x2ef   : > { %v794_v0 = vpop.f32.mrf.mxu0 }
 0x2f0   : > { %v799_v1 = vadd.f32 %v794_v0, %v746_v63 }
 0x2f1   : > { %v1211_v2 = vpop.f32.mrf.mxu0 }
 0x2f2   : > { %801 = vst.msk [vmem:[#allocation5 + $0x8] sm:$0xff] %vm600_vm1, %v799_v1 }
 0x2f3 PF: > { %806 = sbr.rel (!%p1487_p8) target bundleno = 1254 (0x4e6), region = 48  ;;  %v807_v3 = vlaneseq (%p1487_p8)  ;;  %v809_v4 = vstv (%p1487_p8), %s1437_s29  ;;  %v816_v5 = vstv (%p1487_p8), %s1426_s27  ;;  %vm823_vm8 = vcmask (%p1487_p8), 130048   ;;  %v819_v19 = vld [vmem:[#allocation3] sm:$0xff] (%p1487_p8)  ;;  %v820_v22 = vld [vmem:[#allocation3 + $0x8] sm:$0xff] (%p1487_p8)  ;;  %v856_v42 = vld [vmem:[#allocation4] sm:$0xff] (%p1487_p8) }
 0x2f4   : > { %v1360_v18 = vmov (%p1487_p8), 0   ;;  %v1182_v27 = vcombine.low (%p1487_p8), %v1479_v9, %v1481_v10  ;;  %v1361_v28 = vmov (%p1487_p8), 0.0   ;;  %vm1362_vm10 = vmmov (%p1487_p8), 0   ;;  %v857_v45 = vld [vmem:[#allocation4 + $0x8] sm:$0xff] (%p1487_p8) }
 0x2f5   : > { %v808_v6 = vshrl.u32 (%p1487_p8), %v807_v3, 7  ;;  %v812_v7 = vand.u32 (%p1487_p8), 127, %v807_v3  ;;  %1283 = vset.pattern.permute.xlu1 (%p1487_p8), %v1360_v18  ;;  %1284 = vset.pattern.permute.xlu0 (%p1487_p8), %v1360_v18  ;;  %v871_v50 = vld [vmem:[#allocation5] sm:$0xff] (%p1487_p8) }
 0x2f6   : > { %1212 = vmatprep.subr.bf16.mxu0 (%p1487_p8), %v1361_v28  ;;  %1214 = vmatprep.mubr.msk.bf16.mxu0 (%p1487_p8), %vm1362_vm10, %v1361_v28 }
 0x2f7   : > { %v810_v8 = vadd.s32 (%p1487_p8), %v809_v4, %v808_v6  ;;  %vm817_vm6 = vcmp.lt.s32.totalorder (%p1487_p8), %v812_v7, %v816_v5  ;;  %1213 = vmatpush3.bf16.msra.mxu0 (%p1487_p8), %v1182_v27 }
 0x2f9   : > { %vm815_vm7 = vcmp.le.s32.totalorder %v812_v7, %v810_v8  ;;  %v872_v53 = vld [vmem:[#allocation5 + $0x8] sm:$0xff] }
 0x2fa   : > { %vm1518_vm9 = vmand %vm815_vm7, %vm817_vm6 }
 0x2fb   : > { %v821_v12 = vsel %vm1518_vm9, %v1491_v15, -1e+30  ;;  %v822_v13 = vsel %vm1518_vm9, %v1493_v17, -1e+30 }
 0x2fc   : > { %v824_v14 = vsel %vm823_vm8, %v821_v12, -inf  ;;  %v827_v16 = vsel %vm823_vm8, %v822_v13, -inf }
 0x2fd   : > { %825 = vmax.xlane.f32.xlu0 %v824_v14 }
 0x301   : > { %828 = vmax.xlane.f32.xlu0 %v827_v16 }
 0x386   : > { %v826_v20 = vpop.xlane.xlu0 %825 }
 0x387   : > { %v830_v21 = vmax.f32 %v819_v19, %v826_v20 }
 0x389   : > { %v832_v23 = vsub.f32 %v819_v19, %v830_v21  ;;  %940 = vst.msk [vmem:[#allocation3] sm:$0xff] %vm595_vm0, %v830_v21  ;;  %840 = vperm.xlu1 %1283, %v830_v21  }
 0x38a   : > { %v829_v24 = vpop.xlane.xlu0 %828 }
 0x38b   : > { %v831_v25 = vmax.f32 %v820_v22, %v829_v24  ;;  %v834_v40 = vmul.f32 1.442695, %v832_v23 }
 0x38d   : > { %v833_v26 = vsub.f32 %v820_v22, %v831_v25  ;;  %941 = vst.msk [vmem:[#allocation3 + $0x8] sm:$0xff] %vm595_vm0, %v831_v25  ;;  %845 = vperm.xlu1 %1283, %v831_v25  }
 0x38f   : > { %v836_v38 = vmul.f32 1.442695, %v833_v26 }
 0x404   : > { %v841_v29 = vpop.permute.xlu1 %840 }
 0x405   : > { %v848_v30 = vsub.f32 %v1491_v15, %v841_v29 }
 0x407   : > { %v850_v31 = vmul.f32 1.442695, %v848_v30 }
 0x408   : > { %v846_v32 = vpop.permute.xlu1 %845 }
 0x409   : > { %1285 = vpow2.f32 %v850_v31  ;;  %v849_v33 = vsub.f32 %v1493_v17, %v846_v32 }
 0x40b   : > { %v852_v34 = vmul.f32 1.442695, %v849_v33 }
 0x40d   : > { %1287 = vpow2.f32 %v852_v34 }
 0x40e   : > { %1289 = vpow2.f32 %v836_v38 }
 0x40f   : > { %1291 = vpow2.f32 %v834_v40 }
 0x416   : > { %v1286_v35 = vpop.eup %1285 }
 0x417   : > { %v854_v36 = vsel %vm1518_vm9, %v1286_v35, 0.0 }
 0x418   : > { %v860_v9 = vsel %vm823_vm8, %v854_v36, 0.0 }
 0x419   : > { %861 = vadd.xlane.f32.xlu0 %v860_v9 }
 0x41a   : > { %v1288_v10 = vpop.eup %1287 }
 0x41b   : > { %v855_v37 = vsel %vm1518_vm9, %v1288_v10, 0.0  ;;  %v1290_v17 = vpop.eup %1289 }
 0x41c   : > { %v863_v15 = vsel %vm823_vm8, %v855_v37, 0.0  ;;  %v885_v39 = vpack.c.bf16 %v855_v37, %v854_v36  ;;  %v1292_v41 = vpop.eup %1291  ;;  %v859_v47 = vmul.f32 %v1290_v17, %v857_v45 }
 0x41d   : > { %864 = vadd.xlane.f32.xlu1 %v863_v15  ;;  %v858_v43 = vmul.f32 %v1292_v41, %v856_v42 }
 0x41e   : > { %1215 = vmatmul.mubr.msk.bf16.vlgmr.msra.gmra.mxu0 %vm823_vm8, %v885_v39 }
 0x42e   : > { %880 = vperm.xlu1 %1283, %v1290_v17  }
 0x42f   : > { %875 = vperm.xlu0 %1284, %v1292_v41  }
 0x4a2   : > { %v862_v44 = vpop.xlane.xlu0 %861 }
 0x4a3   : > { %v866_v46 = vadd.f32 %v862_v44, %v858_v43 }
 0x4a5   : > { %869 = vst.msk [vmem:[#allocation4] sm:$0xff] %vm595_vm0, %v866_v46 }
 0x4a6   : > { %v865_v48 = vpop.xlane.xlu1 %864 }
 0x4a7   : > { %v867_v49 = vadd.f32 %v865_v48, %v859_v47 }
 0x4a9   : > { %870 = vst.msk [vmem:[#allocation4 + $0x8] sm:$0xff] %vm595_vm0, %v867_v49 }
 0x4aa   : > { %v876_v51 = vpop.permute.xlu0 %875  ;;  %v881_v54 = vpop.permute.xlu1 %880 }
 0x4ab   : > { %v883_v52 = vmul.f32 %v876_v51, %v871_v50  ;;  %v884_v58 = vmul.f32 %v881_v54, %v872_v53 }
 0x4de   : > { %v929_v55 = vpop.f32.mrf.mxu0 }
 0x4df   : > { %v936_v56 = vadd.f32 %v929_v55, %v883_v52 }
 0x4e0   : > { %v1216_v57 = vpop.f32.mrf.mxu0 }
 0x4e1   : > { %938 = vst.msk [vmem:[#allocation5] sm:$0xff] %vm600_vm1, %v936_v56 }
 0x4e2   : > { %v932_v59 = vpop.f32.mrf.mxu0 }
 0x4e3   : > { %v937_v60 = vadd.f32 %v932_v59, %v884_v58 }
 0x4e4   : > { %v1217_v61 = vpop.f32.mrf.mxu0 }
 0x4e5   : > { %939 = vst.msk [vmem:[#allocation5 + $0x8] sm:$0xff] %vm600_vm1, %v937_v60 }
 0x4e6 PF: > { %v958_v62 = vld [vmem:[#allocation4 + $0x8] sm:$0xff]  ;;  %v1363_v63 = vmov 0   ;;  %v946_v0 = vld [vmem:[#allocation4] sm:$0xff]  ;;  %s1364_s27 = smov 8   ;;  %vm973_vm11 = vcmask 126016  }
 0x4e7   : > { %1293 = vset.pattern.permute.xlu0 %v1363_v63 }
 0x4e8   : > { %961 = vperm.xlu0 %1293, %v958_v62   ;;  %v945_v6 = vld [vmem:[#allocation5] sm:$0xff] }
 0x4ec   : > { %949 = vperm.xlu0 %1293, %v946_v0   ;;  %v957_v3 = vld [vmem:[#allocation5 + $0x8] sm:$0xff] }
 0x563   : > { %v962_v1 = vpop.permute.xlu0 %961 }
 0x564   : > { %1294 = vrcp.f32 %v962_v1 }
 0x567   : > { %v950_v2 = vpop.permute.xlu0 %949 }
 0x568   : > { %1296 = vrcp.f32 %v950_v2 }
 0x571   : > { %v1295_v4 = vpop.eup %1294 }
 0x572   : > { %v965_v5 = vmul.f32 %v1295_v4, %v957_v3 }
 0x574   : > { %v1189_v7 = vpack.c.bf16 %v965_v5, %v965_v5 }
 0x575   : > { %v1297_v8 = vpop.eup %1296 }
 0x576   : > { %970 = vrot.lane.b32.xlu1 %v1189_v7, %s1364_s27  ;;  %v953_v11 = vmul.f32 %v1297_v8, %v945_v6 }
 0x578   : > { %v954_v12 = vpack.c.bf16 %v953_v11, %v953_v11 }
 0x57a   : > { %956 = vst.msk [vmem:[%s1458_s17] sm:$0xf] %vm592_vm2, %v954_v12 }
 0x5e8   : > { %v971_v13 = vpop.permute.xlu1 %970 }
 0x5e9   : > { %974 = vst.msk [vmem:[%s1458_s17] sm:$0xf] %vm973_vm11, %v971_v13 }
 0x5ea PF: > { %s20_s23 = sadd.s32 1, %s1350_s23   ;;  %s1574_s20 = smov %s1342_s22 }
 0x5eb   : > { %p17_p9 = scmp.ge.s32.totalorder %s20_s23, 6   ;;  %s1575_s21 = smov %s1346_s0 }
 0x5ec   : > { %s1576_s22 = smov %s1579_s24  ;;  %s1577_s0 = smov %s1583_s25 }
 0x5ed   :  { %19 = sbr.rel (!%p17_p9) target bundleno = 18 (0x12), region = 88 }

</bundles_post_ra>
